<compile_context>
chip_gen: v7x
topology: tpu7x:2x2x1
jax: 0.10.0
libtpu: 0.0.40
codegen_flags: <defaults>
</compile_context>

<pallas_src>
import jax
import jax.numpy as jnp
from jax.experimental import pallas as pl
from jax.experimental.pallas import tpu as pltpu

B_BITS = 4                               # NAE(B=4)
LANES = 128
MAX_ROW_TILE = 4096                      # 4096x128 f32 = 2 MiB / buffer

_SCALE = float(2 ** (B_BITS - 1))        # 8.0
_WRAP = float(2 ** B_BITS)               # 16.0


def _nae_kernel(x_ref, o_ref):
    # Pure VPU path: no int casts, no division, no per-bit loop.
    x = x_ref[...]
    if x.dtype not in (jnp.float32, jnp.bfloat16):
        x = x.astype(jnp.float32)
    q = jnp.clip(x, -4.0, 4.0)
    # t = floor(q_norm * 2^(B-1)) with q_norm = (q + 4) / 4.
    # (_SCALE / 4) is a power of two -> exact scaling, identical to reference.
    t = jnp.floor((q + 4.0) * (_SCALE / 4.0))
    # B-bit wraparound: q_norm == 2.0 exactly (x clamped to +4) -> all bits 0.
    t = jnp.where(t >= _WRAP, jnp.zeros_like(t), t)
    o_ref[...] = (t * (4.0 / _SCALE) - 4.0).astype(o_ref.dtype)


def _nae_value(x):
    """Closed-form NAE forward value in plain jnp (used for tiny tails)."""
    xf = x.astype(jnp.float32)
    q = jnp.clip(xf, -4.0, 4.0)
    t = jnp.floor((q + 4.0) * (_SCALE / 4.0))
    t = jnp.where(t >= _WRAP, 0.0, t)
    return (t * (4.0 / _SCALE) - 4.0).astype(x.dtype)


def _round_up(v, m):
    return ((v + m - 1) // m) * m


def nae_forward(feedback):
    """Elementwise NAE forward for a float array of any shape."""
    orig_shape = feedback.shape
    flat = feedback.reshape(-1)
    n = int(flat.shape[0])

    # Aligned prefix handled by the kernel; sub-128-element tail (if any)
    # handled with plain jnp ops (cheaper than padding + slicing whole array).
    n_main = (n // LANES) * LANES
    if n_main == 0:
        return _nae_value(flat).reshape(orig_shape)

    main = flat if n_main == n else flat[:n_main]
    rows = n_main // LANES
    x2d = main.reshape(rows, LANES)

    if rows >= 8:
        # Target >= ~8 grid steps (so each of v7x's 2 TensorCores gets enough
        # steps to pipeline DMA/compute/writeback), capped at 4096 rows
        # (2 MiB per f32 buffer; 4 double-buffered buffers fit v5e's 16 MiB
        # default scoped VMEM, so no compiler_params override is required).
        row_tile = min(MAX_ROW_TILE, _round_up(pl.cdiv(rows, 8), 8))
    else:
        # Full-array block (allowed even though rows < 8 by the (8,128) rule).
        row_tile = rows
    grid = (pl.cdiv(rows, row_tile),)   # ragged last block masked by Pallas

    out2d = pl.pallas_call(
        _nae_kernel,
        out_shape=jax.ShapeDtypeStruct((rows, LANES), feedback.dtype),
        grid_spec=pltpu.PrefetchScalarGridSpec(
            num_scalar_prefetch=0,
            grid=grid,
            in_specs=[pl.BlockSpec((row_tile, LANES), lambda i: (i, 0))],
            out_specs=pl.BlockSpec((row_tile, LANES), lambda i: (i, 0)),
        ),
        compiler_params=pltpu.CompilerParams(
            dimension_semantics=("parallel",)),
    )(x2d)

    out_flat = out2d.reshape(-1)
    if n_main != n:
        out_flat = jnp.concatenate([out_flat, _nae_value(flat[n_main:])])
    return out_flat.reshape(orig_shape)


def _nae_reference(feedback):
    """Pure-JAX reference mirroring the PyTorch forward value (per-bit loop)."""
    q = jnp.clip(feedback.astype(jnp.float32), -4.0, 4.0)
    q = (q + 4.0) / 4.0
    dot_base = (2.0 ** jnp.arange(B_BITS)).astype(jnp.float32)
    bits = (jnp.floor(q[..., None] * dot_base)).astype(jnp.int32) % 2
    recon = (bits.astype(jnp.float32) / dot_base).sum(-1)
    return (recon * 4.0 - 4.0).astype(feedback.dtype)


if __name__ == "__main__":
    key = jax.random.PRNGKey(0)
    k0, k1, k2 = jax.random.split(key, 3)

    # Small NCHW-like feedback tensor, values spanning beyond the clamp range.
    x = jax.random.normal(k0, (2, 4, 16, 16), dtype=jnp.float32) * 3.0
    # Stress the wraparound / clamp edge cases explicitly.
    x = x.at[0, 0, 0, 0].set(4.0)
    x = x.at[0, 0, 0, 1].set(5.0)
    x = x.at[0, 0, 0, 2].set(-4.0)
    x = x.at[0, 0, 0, 3].set(-7.5)
    x = x.at[0, 0, 0, 4].set(3.999999)

    out = jax.block_until_ready(nae_forward(x))
    ref = _nae_reference(x)
    assert out.shape == x.shape
    assert jnp.allclose(out, ref, atol=1e-6), "mismatch vs reference"

    # Ragged-size paths: pure-tail (<128 elements) and prefix + tail.
    x_tail = jax.random.normal(k1, (3, 5, 7), dtype=jnp.float32) * 3.0      # 105
    x_mix = jax.random.normal(k2, (4, 225), dtype=jnp.float32) * 3.0        # 900
    for xi in (x_tail, x_mix):
        oi = jax.block_until_ready(nae_forward(xi))
        assert oi.shape == xi.shape
        assert jnp.allclose(oi, _nae_reference(xi), atol=1e-6), "ragged mismatch"

    print("KERNEL_OK")
</pallas_src>

<mosaic_0001>
module attributes {stable_mosaic.version = 11 : i64} {
  func.func @_nae_kernel(%arg0: i32, %arg1: memref<8x128xf32, #tpu.memory_space<vmem>>, %arg2: memref<8x128xf32, #tpu.memory_space<vmem>>) attributes {dimension_semantics = [#tpu.dimension_semantics<parallel>], iteration_bounds = array<i64: 2>, scalar_prefetch = 0 : i64, scratch_operands = 0 : i64, tpu.core_type = #tpu.core_type<tc>, window_params = [{transform_indices = @transform_0, window_bounds = array<i64: 8, 128>}, {transform_indices = @transform_1, window_bounds = array<i64: 8, 128>}]} {
    %c0 = arith.constant 0 : index
    %c0_0 = arith.constant 0 : index
    %0 = vector.load %arg1[%c0, %c0_0] : memref<8x128xf32, #tpu.memory_space<vmem>>, vector<8x128xf32>
    %cst = arith.constant -4.000000e+00 : f32
    %cst_1 = arith.constant 4.000000e+00 : f32
    %1 = vector.broadcast %cst : f32 to vector<8x128xf32>
    %2 = arith.maximumf %1, %0 : vector<8x128xf32>
    %3 = vector.broadcast %cst_1 : f32 to vector<8x128xf32>
    %4 = arith.minimumf %3, %2 : vector<8x128xf32>
    %cst_2 = arith.constant 4.000000e+00 : f32
    %5 = vector.broadcast %cst_2 : f32 to vector<8x128xf32>
    %6 = arith.addf %4, %5 : vector<8x128xf32>
    %cst_3 = arith.constant 2.000000e+00 : f32
    %7 = vector.broadcast %cst_3 : f32 to vector<8x128xf32>
    %8 = arith.mulf %6, %7 : vector<8x128xf32>
    %9 = math.floor %8 : vector<8x128xf32>
    %cst_4 = arith.constant 1.600000e+01 : f32
    %10 = vector.broadcast %cst_4 : f32 to vector<8x128xf32>
    %11 = arith.cmpf oge, %9, %10 : vector<8x128xf32>
    %cst_5 = arith.constant 0.000000e+00 : f32
    %12 = vector.broadcast %cst_5 : f32 to vector<8x128xf32>
    %13 = arith.select %11, %12, %9 : vector<8x128xi1>, vector<8x128xf32>
    %cst_6 = arith.constant 5.000000e-01 : f32
    %14 = vector.broadcast %cst_6 : f32 to vector<8x128xf32>
    %15 = arith.mulf %13, %14 : vector<8x128xf32>
    %cst_7 = arith.constant 4.000000e+00 : f32
    %16 = vector.broadcast %cst_7 : f32 to vector<8x128xf32>
    %17 = arith.subf %15, %16 : vector<8x128xf32>
    %c0_8 = arith.constant 0 : index
    %c0_9 = arith.constant 0 : index
    %18 = vector.load %arg2[%c0_8, %c0_9] : memref<8x128xf32, #tpu.memory_space<vmem>>, vector<8x128xf32>
    tpu.vector_store %arg2[%c0_8, %c0_9], %17 {strides = array<i32>} : memref<8x128xf32, #tpu.memory_space<vmem>>, vector<8x128xf32>,
    return
  }
  func.func @transform_0(%arg0: i32) -> (i32, i32) {
    %c0_i32 = arith.constant 0 : i32
    %c0_i32_0 = arith.constant 0 : i32
    return %arg0, %c0_i32 : i32, i32
  }
  func.func @transform_1(%arg0: i32) -> (i32, i32) {
    %c0_i32 = arith.constant 0 : i32
    %c0_i32_0 = arith.constant 0 : i32
    return %arg0, %c0_i32 : i32, i32
  }
}

</mosaic_0001>

<bundles_post_ra>
// kernel: tpu_custom_call.1
= control target key start
LH: loop header
LB: loop body
LE: loop exit
PB: predicated region body
PF: predicated region fallthrough
CT: control target
= control target key end

     0   :  { %6 = vsyncpa [#allocation3], 0  ;;  %s558_s0 = inlined_call_operand.hbm [shape: f32[16,128], index: 0, kind: input, shape index: {}]   ;;  %s559_s1 = inlined_call_operand.hbm [shape: f32[16,128], index: 1, kind: output, shape index: {}]  }
   0x1   :  { %8 = vsyncpa [#allocation3 + $0x1], 0 }
   0x2   :  { %9 = vsyncpa [#allocation4], 0 }
   0x3   :  { %11 = vsyncpa [#allocation4 + $0x1], 0  ;;  %s397_s6 = smov 0   ;;  %s399_s7 = smov 0  }
   0x4   :  { %s401_s8 = smov 0   ;;  %s403_s9 = smov 0  }
   0x5 LB: > { %s418_s10 = sadd.s32 4294967295, %s383_s9   ;;  %s227_s11 = sadd.s32 4294967294, %s383_s9   ;;  %s383_s9 = sphi %s403_s9, %s574_s9   ;;  %s379_s8 = sphi %s401_s8, %s573_s8   ;;  %s375_s7 = sphi %s399_s7, %s572_s7   ;;  %s371_s6 = sphi %s397_s6, %s571_s6  }
   0x6   : > { %s422_s12 = sadd.s32 1, %s383_s9   ;;  %s24_s13 = sadd.s32 1, %s379_s8 }
   0x7   : > { %s21_s14 = ssub.s32 %s383_s9, %s422_s12  ;;  %p31_p0 = scmp.ne.s32.totalorder %s379_s8, %s375_s7 }
   0x8   : > { %p22_p1 = scmp.eq.s32.totalorder %s21_s14, 0  ;;  %p32_p2 = scmp.eq.s32.totalorder %s383_s9, 0 }
   0x9   : > { %p37_p3 = scmp.ne.s32.totalorder %s375_s7, %s371_s6  ;;  %p38_p4 = scmp.eq.s32.totalorder %s418_s10, 0 }
   0xa   : > { %s434_s15 = scalar_select %p22_p1, %s379_s8, %s24_s13  }
   0xb   : > { %p436_p5 = por %p32_p2, %p31_p0  ;;  %p440_p6 = por %p38_p4, %p37_p3 }
   0xc   : > { %p61_p7 = scmp.eq.s32.totalorder %s418_s10, 1  ;;  %p67_p8 = scmp.eq.s32.totalorder %s227_s11, 1 }
   0xd   : > { %p253_p10 = scmp.lt.s32.totalorder %s383_s9, 2  ;;  %s87_s20 = sand.u32 1, %s379_s8  }
   0xe   : > { %p447_p11 = por %p61_p7, %p31_p0  ;;  %p451_p12 = por %p67_p8, %p37_p3 }
   0xf   : > { %s231_s21 = sshll.u32 %s383_s9, 7  ;;  %s230_s22 = sshll.u32 %s87_s20, 3 }
  0x10   : > { %s563_s18 = scalar_select %p447_p11, 1, 0 }
  0x11   : > { %s564_s19 = scalar_select %p451_p12, 1, 0 }
  0x12   : > { %s460_s25 = scalar_lea.hbm %s558_s0, %s231_s21  ;;  %s91_s26 = scalar_lea.vmem [#allocation2], %s230_s22 }
  0x13   : > { %s98_s27 = sshll.u32 %s91_s26, 4  ;;  %p464_p13 = pnand %p253_p10, %p436_p5  ;;  %s468_s27 = int_to_ptr.vmem [resolvable:$true] %s98_s27 }
  0x14   : > { %s88_s29 = scalar_lea.sflag [#allocation3], %s87_s20  ;;  %s287_s30 = scalar_lea.hbm %s460_s25, 128 }
  0x15   : > { %p288_p2 = scmp.ne.s32.totalorder %s460_s25, %s287_s30  ;;  %p289_p3 = pneg %p464_p13 }
  0x16   : > { %s292_s4 = scalar_lea.hbm %s558_s0, 256  ;;  %p293_p5 = scmp.lt.u32.totalorder %s460_s25, %s558_s0 }
  0x17   : > { %p290_p4 = pnand %p289_p3, %p288_p2  ;;  %p294_p8 = scmp.lt.u32.totalorder %s292_s4, %s287_s30 }
  0x18   : > { %p296_p9 = scmp.lt.u32.totalorder %s287_s30, %s460_s25 }
  0x19   : > { %p291_p7 = pneg %p290_p4  ;;  %p295_p10 = por %p294_p8, %p293_p5 }
  0x1b   : > { %p297_p0 = por %p296_p9, %p295_p10 }
  0x1d   : > { %p298_p1 = pnand %p297_p0, %p291_p7 }
  0x1f   : > { %301 = shalt.err (!%p298_p1)
}
  0x20   : > { %s302_s13 = scalar_lea.vmem %s468_s27, 128  ;;  %s385_s14 = smov [#allocation2]  }
  0x21   : > { %p303_p2 = scmp.ne.s32.totalorder %s468_s27, %s302_s13  ;;  %s307_s16 = sshll.u32 %s385_s14, 4  ;;  %s308_s16 = int_to_ptr.vmem [resolvable:$false] %s307_s16 }
  0x22   : > { %s309_s20 = scalar_lea.vmem %s308_s16, 256  ;;  %p310_p11 = scmp.lt.s32.totalorder %s468_s27, %s308_s16 }
  0x23   : > { %p305_p4 = pnand %p303_p2, %p289_p3  ;;  %p311_p5 = scmp.lt.s32.totalorder %s309_s20, %s302_s13 }
  0x25   : > { %p306_p12 = pneg %p305_p4  ;;  %p312_p8 = por %p311_p5, %p310_p11 }
  0x27   : > { %p313_p9 = pnand %p312_p8, %p306_p12 }
  0x29   : > { %316 = shalt.err (!%p313_p9)
}
  0x2a   : > { %248 = dma.hbm_to_vmem [thread:$0]  (!%p464_p13), %s460_s25, 128, %s468_s27, %s88_s29  }
  0x2b   : > { %p566_p0 = scmp.lt.s32.totalorder %s383_s9, 3  ;;  %p567_p1 = scmp.ge.s32.totalorder %s383_s9, 1 }
  0x2d   : > { %p104_p3 = pnand %p567_p1, %p566_p0 }
  0x2e   : > { %s502_s21 = sand.u32 (!%p104_p3), 1, %s375_s7  }
  0x2f   : > { %107 = sbr.rel (%p104_p3) target bundleno = 84 (0x54), region = 24  ;;  %s233_s22 = sshll.u32 (!%p104_p3), %s502_s21, 3 }
  0x30   : > { %s110_s23 = scalar_lea.sflag (!%p104_p3), [#allocation3], %s502_s21  ;;  %s113_s24 = scalar_lea.vmem (!%p104_p3), [#allocation2], %s233_s22 }
  0x36   : > { %362 = dma.done.wait (%p440_p6), %s110_s23, 128  }
  0x37   : > { %364 = vsyncadd (%p440_p6), %s110_s23, 4294967168  ;;  %v132_v0 = vld [vmem:[%s113_s24] sm:$0xff]  ;;  %s131_s25 = scalar_lea.vmem [#allocation5], %s233_s22  ;;  %s238_s27 = sshll.u32 %s418_s10, 7 }
  0x38   : > { %v235_v1 = vclamps-f32 %v132_v0, 4.0  ;;  %s157_s26 = sshll.u32 %s131_s25, 4  ;;  %s516_s29 = scalar_lea.hbm %s559_s1, %s238_s27  ;;  %s511_s26 = int_to_ptr.vmem [resolvable:$true] %s157_s26 }
  0x39   : > { %s144_s30 = scalar_lea.sflag [#allocation4], %s502_s21  ;;  %s317_s2 = scalar_lea.vmem %s511_s26, 128 }
  0x3a   : > { %v135_v2 = vadd.f32 4.0, %v235_v1  ;;  %p318_p6 = scmp.ne.s32.totalorder %s511_s26, %s317_s2  ;;  %p568_p11 = scmp.ne.s32.totalorder %s563_s18, 0 }
  0x3b   : > { %s386_s10 = smov [#allocation5]  }
  0x3c   : > { %v136_v3 = vmul.f32 2.0, %v135_v2  ;;  %p319_p12 = pnand %p318_p6, %p568_p11  ;;  %s321_s3 = sshll.u32 %s386_s10, 4  ;;  %s322_s3 = int_to_ptr.vmem [resolvable:$false] %s321_s3 }
  0x3d   : > { %s323_s4 = scalar_lea.vmem %s322_s3, 256  ;;  %p324_p7 = scmp.lt.s32.totalorder %s511_s26, %s322_s3 }
  0x3e   : > { %v137_v4 = vfloor.f32 %v136_v3  ;;  %p320_p13 = pneg %p319_p12  ;;  %p325_p10 = scmp.lt.s32.totalorder %s323_s4, %s317_s2 }
  0x40   : > { %vm138_vm0 = vcmp.ge.f32.partialorder %v137_v4, 16.0  ;;  %p326_p2 = por %p325_p10, %p324_p7 }
  0x41   : > { %v139_v5 = vsel %vm138_vm0, 0.0, %v137_v4 }
  0x42   : > { %v140_v6 = vmul.f32 0.5, %v139_v5  ;;  %p327_p4 = pnand %p326_p2, %p320_p13 }
  0x44   : > { %v236_v7 = vadd.f32 -4.0, %v140_v6 }
  0x46   : > { %142 = vst [vmem:[%s131_s25] sm:$0xff] %v236_v7 }
  0x47   : > { %330 = shalt.err (!%p327_p4)
}
  0x48   : > { %s331_s5 = scalar_lea.hbm %s516_s29, 128  ;;  %s335_s14 = scalar_lea.hbm %s559_s1, 256 }
  0x49   : > { %p332_p5 = scmp.ne.s32.totalorder %s516_s29, %s331_s5  ;;  %p336_p0 = scmp.lt.u32.totalorder %s516_s29, %s559_s1 }
  0x4a   : > { %p337_p1 = scmp.lt.u32.totalorder %s335_s14, %s331_s5  ;;  %p339_p6 = scmp.lt.u32.totalorder %s331_s5, %s516_s29 }
  0x4b   : > { %p333_p8 = pnand %p332_p5, %p568_p11 }
  0x4c   : > { %p338_p3 = por %p337_p1, %p336_p0 }
  0x4d   : > { %p334_p9 = pneg %p333_p8 }
  0x4e   : > { %p340_p12 = por %p339_p6, %p338_p3 }
  0x50   : > { %p341_p13 = pnand %p340_p12, %p334_p9 }
  0x52   : > { %344 = shalt.err (!%p341_p13)
}
  0x53   : > { %243 = dma.vmem_to_hbm [thread:$0]  (%p568_p11), %s511_s26, 128, %s516_s29, %s144_s30  }
  0x54 PF: > { %s169_s21 = sand.u32 1, %s371_s6   ;;  %p569_p7 = scmp.ne.s32.totalorder %s564_s19, 0 }
  0x55   : > { %p570_p10 = scmp.ge.s32.totalorder %s383_s9, 2  ;;  %s170_s22 = scalar_lea.sflag [#allocation4], %s169_s21 }
  0x57   : > { %p250_p2 = pnand %p570_p10, %p569_p7 }
  0x59   : > { %366 = dma.done.wait (!%p250_p2), %s170_s22, 128  }
  0x5a   : > { %368 = vsyncadd (!%p250_p2), %s170_s22, 4294967168  ;;  %p14_p4 = scmp.ge.s32.totalorder %s422_s12, 4   ;;  %s571_s6 = smov %s375_s7 }
  0x5b   : > { %s572_s7 = smov %s379_s8  ;;  %s573_s8 = smov %s434_s15 }
  0x5c   : > { %s574_s9 = smov %s422_s12  ;;  %16 = sbr.rel (!%p14_p4) target bundleno = 5 (0x5), region = 69 }
  0x63   :  { %175 = vsyncpa [#allocation3], 1 }
  0x64   :  { %177 = vsyncpa [#allocation3 + $0x1], 1 }
  0x65   :  { %178 = vsyncpa [#allocation4], 1 }
  0x66   :  { %180 = vsyncpa [#allocation4 + $0x1], 1 }

</bundles_post_ra>
